<compile_context>
chip_gen: v5e
topology: v5e:2x2
jax: 0.10.0
libtpu: 0.0.40
codegen_flags: <defaults>
</compile_context>

<pallas_src>
import math
import functools

import jax
import jax.numpy as jnp
from jax.experimental import pallas as pl
from jax.experimental.pallas import tpu as pltpu


# ----------------------------------------------------------------------------
# Fused per-hop kernel: LSTM over a time chunk + MaskedAttention epilogue
# ----------------------------------------------------------------------------
def _memnet_hop_kernel(x_ref, wih_ref, whh_ref, b_ref,
                       wk_ref, bk_ref, wv_ref, bv_ref,
                       out_ref,
                       h_scr, c_scr, gx_scr, hbuf,
                       *, t_chunk, b_chunk, hidden):
    tc = pl.program_id(1)

    # New batch block -> reset the recurrent state.
    @pl.when(tc == 0)
    def _():
        h_scr[...] = jnp.zeros_like(h_scr)
        c_scr[...] = jnp.zeros_like(c_scr)

    # ---- hoisted input projection: one MXU matmul for the whole time chunk ----
    # rows are ordered (t, b): row = t * b_chunk + b
    x = x_ref[0]                                              # (t_chunk*b_chunk, H) f32
    gx_scr[...] = (
        jnp.dot(x.astype(jnp.bfloat16), wih_ref[...],
                preferred_element_type=jnp.float32)
        + b_ref[...])                                         # + (b_ih + b_hh), broadcast

    whh = whh_ref[...]                                        # (H, 4H) bf16, VMEM-resident

    # ---- recurrence over the chunk (fully unrolled; only h @ W_hh inside) ----
    h = h_scr[...]                                            # (b_chunk, H) f32
    c = c_scr[...]
    for t in range(t_chunk):
        g = gx_scr[t * b_chunk:(t + 1) * b_chunk, :] + jnp.dot(
            h.astype(jnp.bfloat16), whh, preferred_element_type=jnp.float32)
        # PyTorch LSTM gate order [i, f, g, o]; these lane slices are 128-aligned
        # whenever H is a multiple of 128 (toy H=32 is sub-lane, unavoidable here).
        i_g = jax.nn.sigmoid(g[:, 0 * hidden:1 * hidden])
        f_g = jax.nn.sigmoid(g[:, 1 * hidden:2 * hidden])
        c_g = jnp.tanh(g[:, 2 * hidden:3 * hidden])
        o_g = jax.nn.sigmoid(g[:, 3 * hidden:4 * hidden])
        c = f_g * c + i_g * c_g
        h = o_g * jnp.tanh(c)
        hbuf[t * b_chunk:(t + 1) * b_chunk, :] = h            # collect chunk hidden states
    h_scr[...] = h                                            # carry across chunks
    c_scr[...] = c

    # ---- fused MaskedAttention epilogue ----
    # Per-position diagonal mask => softmax(score) == identity exactly, so the
    # attention output is exactly V = (K @ Wk^T + bk) @ Wv^T + bv with K = diag
    # (the LSTM output).  Q projection / QK^T / softmax / P@V are dead compute.
    # Dropout on the scores is eval-mode identity.
    hh = hbuf[...]                                            # (t_chunk*b_chunk, H) f32
    k = jnp.dot(hh.astype(jnp.bfloat16), wk_ref[...],
                preferred_element_type=jnp.float32) + bk_ref[...]
    v = jnp.dot(k.astype(jnp.bfloat16), wv_ref[...],
                preferred_element_type=jnp.float32) + bv_ref[...]
    out_ref[0] = v.astype(out_ref.dtype)


def _memory_hop(x, wih_t, whh_t, bias, wk_t, bk, wv_t, bv, *, b_chunk, t_chunk):
    """One hop: X (b_blocks, S*b_chunk, H) time-major-flat -> next X, same layout."""
    b_blocks, rows_total, hidden = x.shape
    seq_len = rows_total // b_chunk
    num_chunks = seq_len // t_chunk
    rows = t_chunk * b_chunk

    kern = functools.partial(_memnet_hop_kernel,
                             t_chunk=t_chunk, b_chunk=b_chunk, hidden=hidden)
    # TODO(synk): for large H on v7x (64 MiB VMEM), single-buffer the grid-invariant
    # weight inputs (pipeline_mode) and re-derive vmem_limit_bytes; not needed at toy size.
    return pl.pallas_call(
        kern,
        out_shape=jax.ShapeDtypeStruct((b_blocks, rows_total, hidden), jnp.float32),
        grid=(b_blocks, num_chunks),
        in_specs=[
            pl.BlockSpec((1, rows, hidden), lambda bb, tc: (bb, tc, 0)),
            # grid-invariant weights/biases: constant index_map -> no per-step re-DMA
            pl.BlockSpec((hidden, 4 * hidden), lambda bb, tc: (0, 0)),   # W_ih^T (bf16)
            pl.BlockSpec((hidden, 4 * hidden), lambda bb, tc: (0, 0)),   # W_hh^T (bf16)
            pl.BlockSpec((1, 4 * hidden), lambda bb, tc: (0, 0)),        # b_ih + b_hh (f32)
            pl.BlockSpec((hidden, hidden), lambda bb, tc: (0, 0)),       # Wk^T (bf16)
            pl.BlockSpec((1, hidden), lambda bb, tc: (0, 0)),            # bk (f32)
            pl.BlockSpec((hidden, hidden), lambda bb, tc: (0, 0)),       # Wv^T (bf16)
            pl.BlockSpec((1, hidden), lambda bb, tc: (0, 0)),            # bv (f32)
        ],
        out_specs=pl.BlockSpec((1, rows, hidden), lambda bb, tc: (bb, tc, 0)),
        scratch_shapes=[
            pltpu.VMEM((b_chunk, hidden), jnp.float32),       # h carry
            pltpu.VMEM((b_chunk, hidden), jnp.float32),       # c carry
            pltpu.VMEM((rows, 4 * hidden), jnp.float32),      # chunk input-projection slab
            pltpu.VMEM((rows, hidden), jnp.float32),          # chunk hidden-state slab
        ],
        compiler_params=pltpu.CompilerParams(
            dimension_semantics=("parallel", "arbitrary"),    # batch parallel (v7x 2x TC),
            vmem_limit_bytes=32 * 1024 * 1024),               # time = true recurrence
    )(x, wih_t, whh_t, bias, wk_t, bk, wv_t, bv)


# ----------------------------------------------------------------------------
# MemoryNetwork forward
# ----------------------------------------------------------------------------
@functools.partial(jax.jit, static_argnames=("num_hops",))
def memory_network_forward(globl, spl, params, *, num_hops):
    # TODO(synk): the original forward calls self.RNN() with no args and feeds
    # (None, None) as the LSTM state (both runtime errors in PyTorch), and
    # create_mask has typos (torch.zerors, n+1 OOB); repaired as
    #   diag = LSTM(X) with zero init state; X = MaskedAttention(diag, spl).
    # With the per-position diagonal mask, softmax(score) is exactly the identity,
    # so the attention output does not depend on the query (spl) — the pure-JAX
    # full-softmax reference below verifies this; spl is therefore unused here.
    B, S, H = globl.shape

    b_chunk = 8 if B % 8 == 0 else B          # sublane-friendly batch block
    t_chunk = 8 if S % 8 == 0 else S          # timesteps per grid step
    b_blocks = B // b_chunk

    # One-time weight prep (transpose + bf16 for the MXU), hoisted out of the hop loop.
    lstm, attn = params["lstm"], params["attn"]
    wih_t = jnp.transpose(lstm["w_ih"]).astype(jnp.bfloat16)       # (H, 4H)
    whh_t = jnp.transpose(lstm["w_hh"]).astype(jnp.bfloat16)       # (H, 4H)
    bias = (lstm["b_ih"] + lstm["b_hh"])[None, :].astype(jnp.float32)
    wk_t = jnp.transpose(attn["wk"]).astype(jnp.bfloat16)          # (H, H)
    bk = attn["bk"][None, :].astype(jnp.float32)
    wv_t = jnp.transpose(attn["wv"]).astype(jnp.bfloat16)          # (H, H)
    bv = attn["bv"][None, :].astype(jnp.float32)
    # attn["wq"], attn["bq"] are dead compute under the diagonal mask (see note above).

    # Single shared activation layout across all hops: (b_blocks, S*b_chunk, H),
    # row = t*b_chunk + b.  Only one transpose in and one out of the whole forward.
    x = (globl.reshape(b_blocks, b_chunk, S, H)
              .transpose(0, 2, 1, 3)
              .reshape(b_blocks, S * b_chunk, H))
    for _ in range(num_hops):
        x = _memory_hop(x, wih_t, whh_t, bias, wk_t, bk, wv_t, bv,
                        b_chunk=b_chunk, t_chunk=t_chunk)
    return (x.reshape(b_blocks, S, b_chunk, H)
             .transpose(0, 2, 1, 3)
             .reshape(B, S, H))


# ----------------------------------------------------------------------------
# Deterministic parameter init (PyTorch-style uniform bounds)
# ----------------------------------------------------------------------------
def _linear(key, in_dim, out_dim):
    kw, kb = jax.random.split(key)
    bound = 1.0 / math.sqrt(in_dim)
    w = jax.random.uniform(kw, (out_dim, in_dim), jnp.float32, minval=-bound, maxval=bound)
    b = jax.random.uniform(kb, (out_dim,), jnp.float32, minval=-bound, maxval=bound)
    return w, b


def init_params(key, hidden_dim):
    H = hidden_dim
    k_ih, k_hh, k_q, k_k, k_v = jax.random.split(key, 5)
    w_ih, b_ih = _linear(k_ih, H, 4 * H)          # nn.LSTM weight_ih / bias_ih
    w_hh, b_hh = _linear(k_hh, H, 4 * H)          # nn.LSTM weight_hh / bias_hh
    wq, bq = _linear(k_q, H, H)
    wk, bk = _linear(k_k, H, H)
    wv, bv = _linear(k_v, H, H)
    return {
        "lstm": {"w_ih": w_ih, "b_ih": b_ih, "w_hh": w_hh, "b_hh": b_hh},
        "attn": {"wq": wq, "bq": bq, "wk": wk, "bk": bk, "wv": wv, "bv": bv},
    }


# ----------------------------------------------------------------------------
# Pure-JAX reference (same repaired semantics, full masked softmax, all f32)
# ----------------------------------------------------------------------------
def _reference_forward(globl, spl, params, num_hops):
    lstm, attn = params["lstm"], params["attn"]
    H = lstm["w_hh"].shape[1]

    def lstm_ref(x):
        def step(carry, x_t):
            h, c = carry
            gates = (x_t @ lstm["w_ih"].T + lstm["b_ih"]
                     + h @ lstm["w_hh"].T + lstm["b_hh"])
            i, f, g, o = jnp.split(gates, 4, axis=-1)
            c = jax.nn.sigmoid(f) * c + jax.nn.sigmoid(i) * jnp.tanh(g)
            h = jax.nn.sigmoid(o) * jnp.tanh(c)
            return (h, c), h
        B = x.shape[0]
        init = (jnp.zeros((B, H), jnp.float32), jnp.zeros((B, H), jnp.float32))
        _, hs = jax.lax.scan(step, init, jnp.transpose(x, (1, 0, 2)))
        return jnp.transpose(hs, (1, 0, 2))

    def attn_ref(key_in, query_in):
        q = query_in @ attn["wq"].T + attn["bq"]
        k = key_in @ attn["wk"].T + attn["bk"]
        v = k @ attn["wv"].T + attn["bv"]
        score = jnp.einsum("bqh,bkh->bqk", q, k) / math.sqrt(attn["wq"].shape[0])
        S = score.shape[-1]
        score = jnp.where(jnp.eye(S, dtype=bool)[None], score, jnp.float32(-1e9))
        p = jax.nn.softmax(score, axis=-1)
        p = jnp.where(jnp.isnan(p), 0.0, p)        # score.data[score != score] = 0
        return jnp.einsum("bqk,bkh->bqh", p, v)

    X = globl
    for _ in range(num_hops):
        X = attn_ref(lstm_ref(X), spl)
    return X


# ----------------------------------------------------------------------------
# Main
# ----------------------------------------------------------------------------
if __name__ == "__main__":
    B, S, H = 2, 8, 32          # batch_size, seq_len, hidden_dim (small toy shapes)
    NUM_HOPS = 2

    root = jax.random.PRNGKey(0)
    k_g, k_s, k_p = jax.random.split(root, 3)
    globl = jax.random.normal(k_g, (B, S, H), dtype=jnp.float32)
    spl = jax.random.normal(k_s, (B, S, H), dtype=jnp.float32)
    params = init_params(k_p, H)

    out = memory_network_forward(globl, spl, params, num_hops=NUM_HOPS)
    out = jax.block_until_ready(out)
    assert out.shape == (B, S, H)

    ref = _reference_forward(globl, spl, params, NUM_HOPS)
    max_err = float(jnp.max(jnp.abs(out - ref)))
    # bf16 MXU operands vs. the all-f32 reference -> modest tolerance
    assert jnp.allclose(out, ref, atol=5e-2, rtol=5e-2), f"mismatch, max_err={max_err}"

    print("KERNEL_OK")
</pallas_src>

<mosaic_0001>
module attributes {stable_mosaic.version = 11 : i64} {
  func.func @_memnet_hop_kernel(%arg0: i32, %arg1: i32, %arg2: memref<1x16x32xf32, #tpu.memory_space<vmem>>, %arg3: memref<32x128xbf16, #tpu.memory_space<vmem>>, %arg4: memref<32x128xbf16, #tpu.memory_space<vmem>>, %arg5: memref<1x128xf32, #tpu.memory_space<vmem>>, %arg6: memref<32x32xbf16, #tpu.memory_space<vmem>>, %arg7: memref<1x32xf32, #tpu.memory_space<vmem>>, %arg8: memref<32x32xbf16, #tpu.memory_space<vmem>>, %arg9: memref<1x32xf32, #tpu.memory_space<vmem>>, %arg10: memref<1x16x32xf32, #tpu.memory_space<vmem>>, %arg11: memref<2x32xf32, #tpu.memory_space<vmem>>, %arg12: memref<2x32xf32, #tpu.memory_space<vmem>>, %arg13: memref<16x128xf32, #tpu.memory_space<vmem>>, %arg14: memref<16x32xf32, #tpu.memory_space<vmem>>) attributes {dimension_semantics = [#tpu.dimension_semantics<parallel>, #tpu.dimension_semantics<arbitrary>], iteration_bounds = array<i64: 1, 1>, scalar_prefetch = 0 : i64, scratch_operands = 4 : i64, tpu.core_type = #tpu.core_type<tc>, window_params = [{transform_indices = @transform_0, window_bounds = array<i64: 1, 16, 32>}, {pipeline_mode = #tpu.pipeline_mode<synchronous>, transform_indices = @transform_1, window_bounds = array<i64: 32, 128>}, {pipeline_mode = #tpu.pipeline_mode<synchronous>, transform_indices = @transform_2, window_bounds = array<i64: 32, 128>}, {pipeline_mode = #tpu.pipeline_mode<synchronous>, transform_indices = @transform_3, window_bounds = array<i64: 1, 128>}, {pipeline_mode = #tpu.pipeline_mode<synchronous>, transform_indices = @transform_4, window_bounds = array<i64: 32, 32>}, {pipeline_mode = #tpu.pipeline_mode<synchronous>, transform_indices = @transform_5, window_bounds = array<i64: 1, 32>}, {pipeline_mode = #tpu.pipeline_mode<synchronous>, transform_indices = @transform_6, window_bounds = array<i64: 32, 32>}, {pipeline_mode = #tpu.pipeline_mode<synchronous>, transform_indices = @transform_7, window_bounds = array<i64: 1, 32>}, {transform_indices = @transform_8, window_bounds = array<i64: 1, 16, 32>}]} {
    %c0_i32 = arith.constant 0 : i32
    %0 = arith.cmpi eq, %arg1, %c0_i32 : i32
    %1 = arith.extui %0 : i1 to i32
    %c0_i32_0 = arith.constant 0 : i32
    %2 = arith.cmpi ne, %1, %c0_i32_0 : i32
    scf.if %2 {
      %cst_91 = arith.constant 0.000000e+00 : f32
      %273 = vector.broadcast %cst_91 : f32 to vector<2x32xf32>
      %c0_92 = arith.constant 0 : index
      %c0_93 = arith.constant 0 : index
      %274 = vector.load %arg11[%c0_92, %c0_93] : memref<2x32xf32, #tpu.memory_space<vmem>>, vector<2x32xf32>
      tpu.vector_store %arg11[%c0_92, %c0_93], %273 {strides = array<i32>} : memref<2x32xf32, #tpu.memory_space<vmem>>, vector<2x32xf32>,
      %cst_94 = arith.constant 0.000000e+00 : f32
      %275 = vector.broadcast %cst_94 : f32 to vector<2x32xf32>
      %c0_95 = arith.constant 0 : index
      %c0_96 = arith.constant 0 : index
      %276 = vector.load %arg12[%c0_95, %c0_96] : memref<2x32xf32, #tpu.memory_space<vmem>>, vector<2x32xf32>
      tpu.vector_store %arg12[%c0_95, %c0_96], %275 {strides = array<i32>} : memref<2x32xf32, #tpu.memory_space<vmem>>, vector<2x32xf32>,
    } else {
    }
    %c0 = arith.constant 0 : index
    %c0_1 = arith.constant 0 : index
    %c0_2 = arith.constant 0 : index
    %3 = vector.load %arg2[%c0, %c0_1, %c0_2] : memref<1x16x32xf32, #tpu.memory_space<vmem>>, vector<1x16x32xf32>
    %4 = vector.shape_cast %3 : vector<1x16x32xf32> to vector<16x32xf32>
    %5 = arith.truncf %4 : vector<16x32xf32> to vector<16x32xbf16>
    %c0_3 = arith.constant 0 : index
    %c0_4 = arith.constant 0 : index
    %6 = vector.load %arg3[%c0_3, %c0_4] : memref<32x128xbf16, #tpu.memory_space<vmem>>, vector<32x128xbf16>
    %cst = arith.constant dense<0.000000e+00> : vector<16x128xf32>
    %7 = tpu.matmul %5, %6, %cst {dimension_numbers = #tpu.dot_dimension_numbers<[1], [0], [0], [1], [0, 0, 1, 1], [], []>} : vector<16x32xbf16>, vector<32x128xbf16>, vector<16x128xf32> -> vector<16x128xf32>
    %c0_5 = arith.constant 0 : index
    %c0_6 = arith.constant 0 : index
    %8 = vector.load %arg5[%c0_5, %c0_6] : memref<1x128xf32, #tpu.memory_space<vmem>>, vector<1x128xf32>
    %9 = vector.broadcast %8 : vector<1x128xf32> to vector<16x128xf32>
    %10 = arith.addf %7, %9 : vector<16x128xf32>
    %c0_7 = arith.constant 0 : index
    %c0_8 = arith.constant 0 : index
    %11 = vector.load %arg13[%c0_7, %c0_8] : memref<16x128xf32, #tpu.memory_space<vmem>>, vector<16x128xf32>
    tpu.vector_store %arg13[%c0_7, %c0_8], %10 {strides = array<i32>} : memref<16x128xf32, #tpu.memory_space<vmem>>, vector<16x128xf32>,
    %c0_9 = arith.constant 0 : index
    %c0_10 = arith.constant 0 : index
    %12 = vector.load %arg4[%c0_9, %c0_10] : memref<32x128xbf16, #tpu.memory_space<vmem>>, vector<32x128xbf16>
    %c0_11 = arith.constant 0 : index
    %c0_12 = arith.constant 0 : index
    %13 = vector.load %arg11[%c0_11, %c0_12] : memref<2x32xf32, #tpu.memory_space<vmem>>, vector<2x32xf32>
    %c0_13 = arith.constant 0 : index
    %c0_14 = arith.constant 0 : index
    %14 = vector.load %arg12[%c0_13, %c0_14] : memref<2x32xf32, #tpu.memory_space<vmem>>, vector<2x32xf32>
    %c0_15 = arith.constant 0 : index
    %c0_16 = arith.constant 0 : index
    %15 = vector.load %arg13[%c0_15, %c0_16] : memref<16x128xf32, #tpu.memory_space<vmem>>, vector<2x128xf32>
    %16 = arith.truncf %13 : vector<2x32xf32> to vector<2x32xbf16>
    %cst_17 = arith.constant dense<0.000000e+00> : vector<2x128xf32>
    %17 = tpu.matmul %16, %12, %cst_17 {dimension_numbers = #tpu.dot_dimension_numbers<[1], [0], [0], [1], [0, 0, 1, 1], [], []>} : vector<2x32xbf16>, vector<32x128xbf16>, vector<2x128xf32> -> vector<2x128xf32>
    %18 = arith.addf %15, %17 : vector<2x128xf32>
    %19 = vector.extract_strided_slice %18 {offsets = [0, 0], sizes = [2, 32], strides = [1, 1]} : vector<2x128xf32> to vector<2x32xf32>
    %20 = arith.negf %19 : vector<2x32xf32>
    %21 = math.exp %20 : vector<2x32xf32>
    %cst_18 = arith.constant 1.000000e+00 : f32
    %22 = vector.broadcast %cst_18 : f32 to vector<2x32xf32>
    %23 = arith.addf %22, %21 : vector<2x32xf32>
    %24 = arith.divf %22, %23 : vector<2x32xf32>
    %25 = vector.extract_strided_slice %18 {offsets = [0, 32], sizes = [2, 32], strides = [1, 1]} : vector<2x128xf32> to vector<2x32xf32>
    %26 = arith.negf %25 : vector<2x32xf32>
    %27 = math.exp %26 : vector<2x32xf32>
    %cst_19 = arith.constant 1.000000e+00 : f32
    %28 = vector.broadcast %cst_19 : f32 to vector<2x32xf32>
    %29 = arith.addf %28, %27 : vector<2x32xf32>
    %30 = arith.divf %28, %29 : vector<2x32xf32>
    %31 = vector.extract_strided_slice %18 {offsets = [0, 64], sizes = [2, 32], strides = [1, 1]} : vector<2x128xf32> to vector<2x32xf32>
    %32 = math.tanh %31 : vector<2x32xf32>
    %33 = vector.extract_strided_slice %18 {offsets = [0, 96], sizes = [2, 32], strides = [1, 1]} : vector<2x128xf32> to vector<2x32xf32>
    %34 = arith.negf %33 : vector<2x32xf32>
    %35 = math.exp %34 : vector<2x32xf32>
    %cst_20 = arith.constant 1.000000e+00 : f32
    %36 = vector.broadcast %cst_20 : f32 to vector<2x32xf32>
    %37 = arith.addf %36, %35 : vector<2x32xf32>
    %38 = arith.divf %36, %37 : vector<2x32xf32>
    %39 = arith.mulf %30, %14 : vector<2x32xf32>
    %40 = arith.mulf %24, %32 : vector<2x32xf32>
    %41 = arith.addf %39, %40 : vector<2x32xf32>
    %42 = math.tanh %41 : vector<2x32xf32>
    %43 = arith.mulf %38, %42 : vector<2x32xf32>
    %c0_21 = arith.constant 0 : index
    %c0_22 = arith.constant 0 : index
    %44 = vector.load %arg14[%c0_21, %c0_22] : memref<16x32xf32, #tpu.memory_space<vmem>>, vector<2x32xf32>
    tpu.vector_store %arg14[%c0_21, %c0_22], %43 {strides = array<i32>} : memref<16x32xf32, #tpu.memory_space<vmem>>, vector<2x32xf32>,
    %c2 = arith.constant 2 : index
    %c0_23 = arith.constant 0 : index
    %45 = vector.load %arg13[%c2, %c0_23] : memref<16x128xf32, #tpu.memory_space<vmem>>, vector<2x128xf32>
    %46 = arith.truncf %43 : vector<2x32xf32> to vector<2x32xbf16>
    %cst_24 = arith.constant dense<0.000000e+00> : vector<2x128xf32>
    %47 = tpu.matmul %46, %12, %cst_24 {dimension_numbers = #tpu.dot_dimension_numbers<[1], [0], [0], [1], [0, 0, 1, 1], [], []>} : vector<2x32xbf16>, vector<32x128xbf16>, vector<2x128xf32> -> vector<2x128xf32>
    %48 = arith.addf %45, %47 : vector<2x128xf32>
    %49 = vector.extract_strided_slice %48 {offsets = [0, 0], sizes = [2, 32], strides = [1, 1]} : vector<2x128xf32> to vector<2x32xf32>
    %50 = arith.negf %49 : vector<2x32xf32>
    %51 = math.exp %50 : vector<2x32xf32>
    %cst_25 = arith.constant 1.000000e+00 : f32
    %52 = vector.broadcast %cst_25 : f32 to vector<2x32xf32>
    %53 = arith.addf %52, %51 : vector<2x32xf32>
    %54 = arith.divf %52, %53 : vector<2x32xf32>
    %55 = vector.extract_strided_slice %48 {offsets = [0, 32], sizes = [2, 32], strides = [1, 1]} : vector<2x128xf32> to vector<2x32xf32>
    %56 = arith.negf %55 : vector<2x32xf32>
    %57 = math.exp %56 : vector<2x32xf32>
    %cst_26 = arith.constant 1.000000e+00 : f32
    %58 = vector.broadcast %cst_26 : f32 to vector<2x32xf32>
    %59 = arith.addf %58, %57 : vector<2x32xf32>
    %60 = arith.divf %58, %59 : vector<2x32xf32>
    %61 = vector.extract_strided_slice %48 {offsets = [0, 64], sizes = [2, 32], strides = [1, 1]} : vector<2x128xf32> to vector<2x32xf32>
    %62 = math.tanh %61 : vector<2x32xf32>
    %63 = vector.extract_strided_slice %48 {offsets = [0, 96], sizes = [2, 32], strides = [1, 1]} : vector<2x128xf32> to vector<2x32xf32>
    %64 = arith.negf %63 : vector<2x32xf32>
    %65 = math.exp %64 : vector<2x32xf32>
    %cst_27 = arith.constant 1.000000e+00 : f32
    %66 = vector.broadcast %cst_27 : f32 to vector<2x32xf32>
    %67 = arith.addf %66, %65 : vector<2x32xf32>
    %68 = arith.divf %66, %67 : vector<2x32xf32>
    %69 = arith.mulf %60, %41 : vector<2x32xf32>
    %70 = arith.mulf %54, %62 : vector<2x32xf32>
    %71 = arith.addf %69, %70 : vector<2x32xf32>
    %72 = math.tanh %71 : vector<2x32xf32>
    %73 = arith.mulf %68, %72 : vector<2x32xf32>
    %c2_28 = arith.constant 2 : index
    %c0_29 = arith.constant 0 : index
    %74 = vector.load %arg14[%c2_28, %c0_29] : memref<16x32xf32, #tpu.memory_space<vmem>>, vector<2x32xf32>
    tpu.vector_store %arg14[%c2_28, %c0_29], %73 {strides = array<i32>} : memref<16x32xf32, #tpu.memory_space<vmem>>, vector<2x32xf32>,
    %c4 = arith.constant 4 : index
    %c0_30 = arith.constant 0 : index
    %75 = vector.load %arg13[%c4, %c0_30] : memref<16x128xf32, #tpu.memory_space<vmem>>, vector<2x128xf32>
    %76 = arith.truncf %73 : vector<2x32xf32> to vector<2x32xbf16>
    %cst_31 = arith.constant dense<0.000000e+00> : vector<2x128xf32>
    %77 = tpu.matmul %76, %12, %cst_31 {dimension_numbers = #tpu.dot_dimension_numbers<[1], [0], [0], [1], [0, 0, 1, 1], [], []>} : vector<2x32xbf16>, vector<32x128xbf16>, vector<2x128xf32> -> vector<2x128xf32>
    %78 = arith.addf %75, %77 : vector<2x128xf32>
    %79 = vector.extract_strided_slice %78 {offsets = [0, 0], sizes = [2, 32], strides = [1, 1]} : vector<2x128xf32> to vector<2x32xf32>
    %80 = arith.negf %79 : vector<2x32xf32>
    %81 = math.exp %80 : vector<2x32xf32>
    %cst_32 = arith.constant 1.000000e+00 : f32
    %82 = vector.broadcast %cst_32 : f32 to vector<2x32xf32>
    %83 = arith.addf %82, %81 : vector<2x32xf32>
    %84 = arith.divf %82, %83 : vector<2x32xf32>
    %85 = vector.extract_strided_slice %78 {offsets = [0, 32], sizes = [2, 32], strides = [1, 1]} : vector<2x128xf32> to vector<2x32xf32>
    %86 = arith.negf %85 : vector<2x32xf32>
    %87 = math.exp %86 : vector<2x32xf32>
    %cst_33 = arith.constant 1.000000e+00 : f32
    %88 = vector.broadcast %cst_33 : f32 to vector<2x32xf32>
    %89 = arith.addf %88, %87 : vector<2x32xf32>
    %90 = arith.divf %88, %89 : vector<2x32xf32>
    %91 = vector.extract_strided_slice %78 {offsets = [0, 64], sizes = [2, 32], strides = [1, 1]} : vector<2x128xf32> to vector<2x32xf32>
    %92 = math.tanh %91 : vector<2x32xf32>
    %93 = vector.extract_strided_slice %78 {offsets = [0, 96], sizes = [2, 32], strides = [1, 1]} : vector<2x128xf32> to vector<2x32xf32>
    %94 = arith.negf %93 : vector<2x32xf32>
    %95 = math.exp %94 : vector<2x32xf32>
    %cst_34 = arith.constant 1.000000e+00 : f32
    %96 = vector.broadcast %cst_34 : f32 to vector<2x32xf32>
    %97 = arith.addf %96, %95 : vector<2x32xf32>
    %98 = arith.divf %96, %97 : vector<2x32xf32>
    %99 = arith.mulf %90, %71 : vector<2x32xf32>
    %100 = arith.mulf %84, %92 : vector<2x32xf32>
    %101 = arith.addf %99, %100 : vector<2x32xf32>
    %102 = math.tanh %101 : vector<2x32xf32>
    %103 = arith.mulf %98, %102 : vector<2x32xf32>
    %c4_35 = arith.constant 4 : index
    %c0_36 = arith.constant 0 : index
    %104 = vector.load %arg14[%c4_35, %c0_36] : memref<16x32xf32, #tpu.memory_space<vmem>>, vector<2x32xf32>
    tpu.vector_store %arg14[%c4_35, %c0_36], %103 {strides = array<i32>} : memref<16x32xf32, #tpu.memory_space<vmem>>, vector<2x32xf32>,
    %c6 = arith.constant 6 : index
    %c0_37 = arith.constant 0 : index
    %105 = vector.load %arg13[%c6, %c0_37] : memref<16x128xf32, #tpu.memory_space<vmem>>, vector<2x128xf32>
    %106 = arith.truncf %103 : vector<2x32xf32> to vector<2x32xbf16>
    %cst_38 = arith.constant dense<0.000000e+00> : vector<2x128xf32>
    %107 = tpu.matmul %106, %12, %cst_38 {dimension_numbers = #tpu.dot_dimension_numbers<[1], [0], [0], [1], [0, 0, 1, 1], [], []>} : vector<2x32xbf16>, vector<32x128xbf16>, vector<2x128xf32> -> vector<2x128xf32>
    %108 = arith.addf %105, %107 : vector<2x128xf32>
    %109 = vector.extract_strided_slice %108 {offsets = [0, 0], sizes = [2, 32], strides = [1, 1]} : vector<2x128xf32> to vector<2x32xf32>
    %110 = arith.negf %109 : vector<2x32xf32>
    %111 = math.exp %110 : vector<2x32xf32>
    %cst_39 = arith.constant 1.000000e+00 : f32
    %112 = vector.broadcast %cst_39 : f32 to vector<2x32xf32>
    %113 = arith.addf %112, %111 : vector<2x32xf32>
    %114 = arith.divf %112, %113 : vector<2x32xf32>
    %115 = vector.extract_strided_slice %108 {offsets = [0, 32], sizes = [2, 32], strides = [1, 1]} : vector<2x128xf32> to vector<2x32xf32>
    %116 = arith.negf %115 : vector<2x32xf32>
    %117 = math.exp %116 : vector<2x32xf32>
    %cst_40 = arith.constant 1.000000e+00 : f32
    %118 = vector.broadcast %cst_40 : f32 to vector<2x32xf32>
    %119 = arith.addf %118, %117 : vector<2x32xf32>
    %120 = arith.divf %118, %119 : vector<2x32xf32>
    %121 = vector.extract_strided_slice %108 {offsets = [0, 64], sizes = [2, 32], strides = [1, 1]} : vector<2x128xf32> to vector<2x32xf32>
    %122 = math.tanh %121 : vector<2x32xf32>
    %123 = vector.extract_strided_slice %108 {offsets = [0, 96], sizes = [2, 32], strides = [1, 1]} : vector<2x128xf32> to vector<2x32xf32>
    %124 = arith.negf %123 : vector<2x32xf32>
    %125 = math.exp %124 : vector<2x32xf32>
    %cst_41 = arith.constant 1.000000e+00 : f32
    %126 = vector.broadcast %cst_41 : f32 to vector<2x32xf32>
    %127 = arith.addf %126, %125 : vector<2x32xf32>
    %128 = arith.divf %126, %127 : vector<2x32xf32>
    %129 = arith.mulf %120, %101 : vector<2x32xf32>
    %130 = arith.mulf %114, %122 : vector<2x32xf32>
    %131 = arith.addf %129, %130 : vector<2x32xf32>
    %132 = math.tanh %131 : vector<2x32xf32>
    %133 = arith.mulf %128, %132 : vector<2x32xf32>
    %c6_42 = arith.constant 6 : index
    %c0_43 = arith.constant 0 : index
    %134 = vector.load %arg14[%c6_42, %c0_43] : memref<16x32xf32, #tpu.memory_space<vmem>>, vector<2x32xf32>
    tpu.vector_store %arg14[%c6_42, %c0_43], %133 {strides = array<i32>} : memref<16x32xf32, #tpu.memory_space<vmem>>, vector<2x32xf32>,
    %c8 = arith.constant 8 : index
    %c0_44 = arith.constant 0 : index
    %135 = vector.load %arg13[%c8, %c0_44] : memref<16x128xf32, #tpu.memory_space<vmem>>, vector<2x128xf32>
    %136 = arith.truncf %133 : vector<2x32xf32> to vector<2x32xbf16>
    %cst_45 = arith.constant dense<0.000000e+00> : vector<2x128xf32>
    %137 = tpu.matmul %136, %12, %cst_45 {dimension_numbers = #tpu.dot_dimension_numbers<[1], [0], [0], [1], [0, 0, 1, 1], [], []>} : vector<2x32xbf16>, vector<32x128xbf16>, vector<2x128xf32> -> vector<2x128xf32>
    %138 = arith.addf %135, %137 : vector<2x128xf32>
    %139 = vector.extract_strided_slice %138 {offsets = [0, 0], sizes = [2, 32], strides = [1, 1]} : vector<2x128xf32> to vector<2x32xf32>
    %140 = arith.negf %139 : vector<2x32xf32>
    %141 = math.exp %140 : vector<2x32xf32>
    %cst_46 = arith.constant 1.000000e+00 : f32
    %142 = vector.broadcast %cst_46 : f32 to vector<2x32xf32>
    %143 = arith.addf %142, %141 : vector<2x32xf32>
    %144 = arith.divf %142, %143 : vector<2x32xf32>
    %145 = vector.extract_strided_slice %138 {offsets = [0, 32], sizes = [2, 32], strides = [1, 1]} : vector<2x128xf32> to vector<2x32xf32>
    %146 = arith.negf %145 : vector<2x32xf32>
    %147 = math.exp %146 : vector<2x32xf32>
    %cst_47 = arith.constant 1.000000e+00 : f32
    %148 = vector.broadcast %cst_47 : f32 to vector<2x32xf32>
    %149 = arith.addf %148, %147 : vector<2x32xf32>
    %150 = arith.divf %148, %149 : vector<2x32xf32>
    %151 = vector.extract_strided_slice %138 {offsets = [0, 64], sizes = [2, 32], strides = [1, 1]} : vector<2x128xf32> to vector<2x32xf32>
    %152 = math.tanh %151 : vector<2x32xf32>
    %153 = vector.extract_strided_slice %138 {offsets = [0, 96], sizes = [2, 32], strides = [1, 1]} : vector<2x128xf32> to vector<2x32xf32>
    %154 = arith.negf %153 : vector<2x32xf32>
    %155 = math.exp %154 : vector<2x32xf32>
    %cst_48 = arith.constant 1.000000e+00 : f32
    %156 = vector.broadcast %cst_48 : f32 to vector<2x32xf32>
    %157 = arith.addf %156, %155 : vector<2x32xf32>
    %158 = arith.divf %156, %157 : vector<2x32xf32>
    %159 = arith.mulf %150, %131 : vector<2x32xf32>
    %160 = arith.mulf %144, %152 : vector<2x32xf32>
    %161 = arith.addf %159, %160 : vector<2x32xf32>
    %162 = math.tanh %161 : vector<2x32xf32>
    %163 = arith.mulf %158, %162 : vector<2x32xf32>
    %c8_49 = arith.constant 8 : index
    %c0_50 = arith.constant 0 : index
    %164 = vector.load %arg14[%c8_49, %c0_50] : memref<16x32xf32, #tpu.memory_space<vmem>>, vector<2x32xf32>
    tpu.vector_store %arg14[%c8_49, %c0_50], %163 {strides = array<i32>} : memref<16x32xf32, #tpu.memory_space<vmem>>, vector<2x32xf32>,
    %c10 = arith.constant 10 : index
    %c0_51 = arith.constant 0 : index
    %165 = vector.load %arg13[%c10, %c0_51] : memref<16x128xf32, #tpu.memory_space<vmem>>, vector<2x128xf32>
    %166 = arith.truncf %163 : vector<2x32xf32> to vector<2x32xbf16>
    %cst_52 = arith.constant dense<0.000000e+00> : vector<2x128xf32>
    %167 = tpu.matmul %166, %12, %cst_52 {dimension_numbers = #tpu.dot_dimension_numbers<[1], [0], [0], [1], [0, 0, 1, 1], [], []>} : vector<2x32xbf16>, vector<32x128xbf16>, vector<2x128xf32> -> vector<2x128xf32>
    %168 = arith.addf %165, %167 : vector<2x128xf32>
    %169 = vector.extract_strided_slice %168 {offsets = [0, 0], sizes = [2, 32], strides = [1, 1]} : vector<2x128xf32> to vector<2x32xf32>
    %170 = arith.negf %169 : vector<2x32xf32>
    %171 = math.exp %170 : vector<2x32xf32>
    %cst_53 = arith.constant 1.000000e+00 : f32
    %172 = vector.broadcast %cst_53 : f32 to vector<2x32xf32>
    %173 = arith.addf %172, %171 : vector<2x32xf32>
    %174 = arith.divf %172, %173 : vector<2x32xf32>
    %175 = vector.extract_strided_slice %168 {offsets = [0, 32], sizes = [2, 32], strides = [1, 1]} : vector<2x128xf32> to vector<2x32xf32>
    %176 = arith.negf %175 : vector<2x32xf32>
    %177 = math.exp %176 : vector<2x32xf32>
    %cst_54 = arith.constant 1.000000e+00 : f32
    %178 = vector.broadcast %cst_54 : f32 to vector<2x32xf32>
    %179 = arith.addf %178, %177 : vector<2x32xf32>
    %180 = arith.divf %178, %179 : vector<2x32xf32>
    %181 = vector.extract_strided_slice %168 {offsets = [0, 64], sizes = [2, 32], strides = [1, 1]} : vector<2x128xf32> to vector<2x32xf32>
    %182 = math.tanh %181 : vector<2x32xf32>
    %183 = vector.extract_strided_slice %168 {offsets = [0, 96], sizes = [2, 32], strides = [1, 1]} : vector<2x128xf32> to vector<2x32xf32>
    %184 = arith.negf %183 : vector<2x32xf32>
    %185 = math.exp %184 : vector<2x32xf32>
    %cst_55 = arith.constant 1.000000e+00 : f32
    %186 = vector.broadcast %cst_55 : f32 to vector<2x32xf32>
    %187 = arith.addf %186, %185 : vector<2x32xf32>
    %188 = arith.divf %186, %187 : vector<2x32xf32>
    %189 = arith.mulf %180, %161 : vector<2x32xf32>
    %190 = arith.mulf %174, %182 : vector<2x32xf32>
    %191 = arith.addf %189, %190 : vector<2x32xf32>
    %192 = math.tanh %191 : vector<2x32xf32>
    %193 = arith.mulf %188, %192 : vector<2x32xf32>
    %c10_56 = arith.constant 10 : index
    %c0_57 = arith.constant 0 : index
    %194 = vector.load %arg14[%c10_56, %c0_57] : memref<16x32xf32, #tpu.memory_space<vmem>>, vector<2x32xf32>
    tpu.vector_store %arg14[%c10_56, %c0_57], %193 {strides = array<i32>} : memref<16x32xf32, #tpu.memory_space<vmem>>, vector<2x32xf32>,
    %c12 = arith.constant 12 : index
    %c0_58 = arith.constant 0 : index
    %195 = vector.load %arg13[%c12, %c0_58] : memref<16x128xf32, #tpu.memory_space<vmem>>, vector<2x128xf32>
    %196 = arith.truncf %193 : vector<2x32xf32> to vector<2x32xbf16>
    %cst_59 = arith.constant dense<0.000000e+00> : vector<2x128xf32>
    %197 = tpu.matmul %196, %12, %cst_59 {dimension_numbers = #tpu.dot_dimension_numbers<[1], [0], [0], [1], [0, 0, 1, 1], [], []>} : vector<2x32xbf16>, vector<32x128xbf16>, vector<2x128xf32> -> vector<2x128xf32>
    %198 = arith.addf %195, %197 : vector<2x128xf32>
    %199 = vector.extract_strided_slice %198 {offsets = [0, 0], sizes = [2, 32], strides = [1, 1]} : vector<2x128xf32> to vector<2x32xf32>
    %200 = arith.negf %199 : vector<2x32xf32>
    %201 = math.exp %200 : vector<2x32xf32>
    %cst_60 = arith.constant 1.000000e+00 : f32
    %202 = vector.broadcast %cst_60 : f32 to vector<2x32xf32>
    %203 = arith.addf %202, %201 : vector<2x32xf32>
    %204 = arith.divf %202, %203 : vector<2x32xf32>
    %205 = vector.extract_strided_slice %198 {offsets = [0, 32], sizes = [2, 32], strides = [1, 1]} : vector<2x128xf32> to vector<2x32xf32>
    %206 = arith.negf %205 : vector<2x32xf32>
    %207 = math.exp %206 : vector<2x32xf32>
    %cst_61 = arith.constant 1.000000e+00 : f32
    %208 = vector.broadcast %cst_61 : f32 to vector<2x32xf32>
    %209 = arith.addf %208, %207 : vector<2x32xf32>
    %210 = arith.divf %208, %209 : vector<2x32xf32>
    %211 = vector.extract_strided_slice %198 {offsets = [0, 64], sizes = [2, 32], strides = [1, 1]} : vector<2x128xf32> to vector<2x32xf32>
    %212 = math.tanh %211 : vector<2x32xf32>
    %213 = vector.extract_strided_slice %198 {offsets = [0, 96], sizes = [2, 32], strides = [1, 1]} : vector<2x128xf32> to vector<2x32xf32>
    %214 = arith.negf %213 : vector<2x32xf32>
    %215 = math.exp %214 : vector<2x32xf32>
    %cst_62 = arith.constant 1.000000e+00 : f32
    %216 = vector.broadcast %cst_62 : f32 to vector<2x32xf32>
    %217 = arith.addf %216, %215 : vector<2x32xf32>
    %218 = arith.divf %216, %217 : vector<2x32xf32>
    %219 = arith.mulf %210, %191 : vector<2x32xf32>
    %220 = arith.mulf %204, %212 : vector<2x32xf32>
    %221 = arith.addf %219, %220 : vector<2x32xf32>
    %222 = math.tanh %221 : vector<2x32xf32>
    %223 = arith.mulf %218, %222 : vector<2x32xf32>
    %c12_63 = arith.constant 12 : index
    %c0_64 = arith.constant 0 : index
    %224 = vector.load %arg14[%c12_63, %c0_64] : memref<16x32xf32, #tpu.memory_space<vmem>>, vector<2x32xf32>
    tpu.vector_store %arg14[%c12_63, %c0_64], %223 {strides = array<i32>} : memref<16x32xf32, #tpu.memory_space<vmem>>, vector<2x32xf32>,
    %c14 = arith.constant 14 : index
    %c0_65 = arith.constant 0 : index
    %225 = vector.load %arg13[%c14, %c0_65] : memref<16x128xf32, #tpu.memory_space<vmem>>, vector<2x128xf32>
    %226 = arith.truncf %223 : vector<2x32xf32> to vector<2x32xbf16>
    %cst_66 = arith.constant dense<0.000000e+00> : vector<2x128xf32>
    %227 = tpu.matmul %226, %12, %cst_66 {dimension_numbers = #tpu.dot_dimension_numbers<[1], [0], [0], [1], [0, 0, 1, 1], [], []>} : vector<2x32xbf16>, vector<32x128xbf16>, vector<2x128xf32> -> vector<2x128xf32>
    %228 = arith.addf %225, %227 : vector<2x128xf32>
    %229 = vector.extract_strided_slice %228 {offsets = [0, 0], sizes = [2, 32], strides = [1, 1]} : vector<2x128xf32> to vector<2x32xf32>
    %230 = arith.negf %229 : vector<2x32xf32>
    %231 = math.exp %230 : vector<2x32xf32>
    %cst_67 = arith.constant 1.000000e+00 : f32
    %232 = vector.broadcast %cst_67 : f32 to vector<2x32xf32>
    %233 = arith.addf %232, %231 : vector<2x32xf32>
    %234 = arith.divf %232, %233 : vector<2x32xf32>
    %235 = vector.extract_strided_slice %228 {offsets = [0, 32], sizes = [2, 32], strides = [1, 1]} : vector<2x128xf32> to vector<2x32xf32>
    %236 = arith.negf %235 : vector<2x32xf32>
    %237 = math.exp %236 : vector<2x32xf32>
    %cst_68 = arith.constant 1.000000e+00 : f32
    %238 = vector.broadcast %cst_68 : f32 to vector<2x32xf32>
    %239 = arith.addf %238, %237 : vector<2x32xf32>
    %240 = arith.divf %238, %239 : vector<2x32xf32>
    %241 = vector.extract_strided_slice %228 {offsets = [0, 64], sizes = [2, 32], strides = [1, 1]} : vector<2x128xf32> to vector<2x32xf32>
    %242 = math.tanh %241 : vector<2x32xf32>
    %243 = vector.extract_strided_slice %228 {offsets = [0, 96], sizes = [2, 32], strides = [1, 1]} : vector<2x128xf32> to vector<2x32xf32>
    %244 = arith.negf %243 : vector<2x32xf32>
    %245 = math.exp %244 : vector<2x32xf32>
    %cst_69 = arith.constant 1.000000e+00 : f32
    %246 = vector.broadcast %cst_69 : f32 to vector<2x32xf32>
    %247 = arith.addf %246, %245 : vector<2x32xf32>
    %248 = arith.divf %246, %247 : vector<2x32xf32>
    %249 = arith.mulf %240, %221 : vector<2x32xf32>
    %250 = arith.mulf %234, %242 : vector<2x32xf32>
    %251 = arith.addf %249, %250 : vector<2x32xf32>
    %252 = math.tanh %251 : vector<2x32xf32>
    %253 = arith.mulf %248, %252 : vector<2x32xf32>
    %c14_70 = arith.constant 14 : index
    %c0_71 = arith.constant 0 : index
    %254 = vector.load %arg14[%c14_70, %c0_71] : memref<16x32xf32, #tpu.memory_space<vmem>>, vector<2x32xf32>
    tpu.vector_store %arg14[%c14_70, %c0_71], %253 {strides = array<i32>} : memref<16x32xf32, #tpu.memory_space<vmem>>, vector<2x32xf32>,
    %c0_72 = arith.constant 0 : index
    %c0_73 = arith.constant 0 : index
    %255 = vector.load %arg11[%c0_72, %c0_73] : memref<2x32xf32, #tpu.memory_space<vmem>>, vector<2x32xf32>
    tpu.vector_store %arg11[%c0_72, %c0_73], %253 {strides = array<i32>} : memref<2x32xf32, #tpu.memory_space<vmem>>, vector<2x32xf32>,
    %c0_74 = arith.constant 0 : index
    %c0_75 = arith.constant 0 : index
    %256 = vector.load %arg12[%c0_74, %c0_75] : memref<2x32xf32, #tpu.memory_space<vmem>>, vector<2x32xf32>
    tpu.vector_store %arg12[%c0_74, %c0_75], %251 {strides = array<i32>} : memref<2x32xf32, #tpu.memory_space<vmem>>, vector<2x32xf32>,
    %c0_76 = arith.constant 0 : index
    %c0_77 = arith.constant 0 : index
    %257 = vector.load %arg14[%c0_76, %c0_77] : memref<16x32xf32, #tpu.memory_space<vmem>>, vector<16x32xf32>
    %258 = arith.truncf %257 : vector<16x32xf32> to vector<16x32xbf16>
    %c0_78 = arith.constant 0 : index
    %c0_79 = arith.constant 0 : index
    %259 = vector.load %arg6[%c0_78, %c0_79] : memref<32x32xbf16, #tpu.memory_space<vmem>>, vector<32x32xbf16>
    %cst_80 = arith.constant dense<0.000000e+00> : vector<16x32xf32>
    %260 = tpu.matmul %258, %259, %cst_80 {dimension_numbers = #tpu.dot_dimension_numbers<[1], [0], [0], [1], [0, 0, 1, 1], [], []>} : vector<16x32xbf16>, vector<32x32xbf16>, vector<16x32xf32> -> vector<16x32xf32>
    %c0_81 = arith.constant 0 : index
    %c0_82 = arith.constant 0 : index
    %261 = vector.load %arg7[%c0_81, %c0_82] : memref<1x32xf32, #tpu.memory_space<vmem>>, vector<1x32xf32>
    %262 = vector.broadcast %261 : vector<1x32xf32> to vector<16x32xf32>
    %263 = arith.addf %260, %262 : vector<16x32xf32>
    %264 = arith.truncf %263 : vector<16x32xf32> to vector<16x32xbf16>
    %c0_83 = arith.constant 0 : index
    %c0_84 = arith.constant 0 : index
    %265 = vector.load %arg8[%c0_83, %c0_84] : memref<32x32xbf16, #tpu.memory_space<vmem>>, vector<32x32xbf16>
    %cst_85 = arith.constant dense<0.000000e+00> : vector<16x32xf32>
    %266 = tpu.matmul %264, %265, %cst_85 {dimension_numbers = #tpu.dot_dimension_numbers<[1], [0], [0], [1], [0, 0, 1, 1], [], []>} : vector<16x32xbf16>, vector<32x32xbf16>, vector<16x32xf32> -> vector<16x32xf32>
    %c0_86 = arith.constant 0 : index
    %c0_87 = arith.constant 0 : index
    %267 = vector.load %arg9[%c0_86, %c0_87] : memref<1x32xf32, #tpu.memory_space<vmem>>, vector<1x32xf32>
    %268 = vector.broadcast %267 : vector<1x32xf32> to vector<16x32xf32>
    %269 = arith.addf %266, %268 : vector<16x32xf32>
    %c0_88 = arith.constant 0 : index
    %c0_89 = arith.constant 0 : index
    %c0_90 = arith.constant 0 : index
    %270 = vector.load %arg10[%c0_88, %c0_89, %c0_90] : memref<1x16x32xf32, #tpu.memory_space<vmem>>, vector<1x16x32xf32>
    %271 = vector.shape_cast %270 : vector<1x16x32xf32> to vector<16x32xf32>
    %272 = vector.shape_cast %269 : vector<16x32xf32> to vector<1x16x32xf32>
    tpu.vector_store %arg10[%c0_88, %c0_89, %c0_90], %272 {strides = array<i32>} : memref<1x16x32xf32, #tpu.memory_space<vmem>>, vector<1x16x32xf32>,
    return
  }
  func.func @transform_0(%arg0: i32, %arg1: i32) -> (i32, i32, i32) {
    %c0_i32 = arith.constant 0 : i32
    %c0_i32_0 = arith.constant 0 : i32
    return %arg0, %arg1, %c0_i32 : i32, i32, i32
  }
  func.func @transform_1(%arg0: i32, %arg1: i32) -> (i32, i32) {
    %c0_i32 = arith.constant 0 : i32
    %c0_i32_0 = arith.constant 0 : i32
    %c0_i32_1 = arith.constant 0 : i32
    return %c0_i32, %c0_i32_0 : i32, i32
  }
  func.func @transform_2(%arg0: i32, %arg1: i32) -> (i32, i32) {
    %c0_i32 = arith.constant 0 : i32
    %c0_i32_0 = arith.constant 0 : i32
    %c0_i32_1 = arith.constant 0 : i32
    return %c0_i32, %c0_i32_0 : i32, i32
  }
  func.func @transform_3(%arg0: i32, %arg1: i32) -> (i32, i32) {
    %c0_i32 = arith.constant 0 : i32
    %c0_i32_0 = arith.constant 0 : i32
    %c0_i32_1 = arith.constant 0 : i32
    return %c0_i32, %c0_i32_0 : i32, i32
  }
  func.func @transform_4(%arg0: i32, %arg1: i32) -> (i32, i32) {
    %c0_i32 = arith.constant 0 : i32
    %c0_i32_0 = arith.constant 0 : i32
    %c0_i32_1 = arith.constant 0 : i32
    return %c0_i32, %c0_i32_0 : i32, i32
  }
  func.func @transform_5(%arg0: i32, %arg1: i32) -> (i32, i32) {
    %c0_i32 = arith.constant 0 : i32
    %c0_i32_0 = arith.constant 0 : i32
    %c0_i32_1 = arith.constant 0 : i32
    return %c0_i32, %c0_i32_0 : i32, i32
  }
  func.func @transform_6(%arg0: i32, %arg1: i32) -> (i32, i32) {
    %c0_i32 = arith.constant 0 : i32
    %c0_i32_0 = arith.constant 0 : i32
    %c0_i32_1 = arith.constant 0 : i32
    return %c0_i32, %c0_i32_0 : i32, i32
  }
  func.func @transform_7(%arg0: i32, %arg1: i32) -> (i32, i32) {
    %c0_i32 = arith.constant 0 : i32
    %c0_i32_0 = arith.constant 0 : i32
    %c0_i32_1 = arith.constant 0 : i32
    return %c0_i32, %c0_i32_0 : i32, i32
  }
  func.func @transform_8(%arg0: i32, %arg1: i32) -> (i32, i32, i32) {
    %c0_i32 = arith.constant 0 : i32
    %c0_i32_0 = arith.constant 0 : i32
    return %arg0, %arg1, %c0_i32 : i32, i32, i32
  }
}

</mosaic_0001>

<bundles_post_ra>
// kernel: memory_network_forward.2
= control target key start
LH: loop header
LB: loop body
LE: loop exit
PB: predicated region body
PF: predicated region fallthrough
CT: control target
= control target key end

     0   :  { %vm34_vm0 = vcmask 254976   ;;  %v832_v2 = vmov 0.0   ;;  %vm60_vm1 = vcmask 261120   ;;  %s834_s17 = smov 32   ;;  %s1021_s1 = inlined_call_operand.vmem [shape: bf16[32,128], index: 1, kind: input, shape index: {}]   ;;  %s1022_s2 = inlined_call_operand.vmem [shape: bf16[32,128], index: 2, kind: input, shape index: {}]   ;;  %s1023_s0 = inlined_call_operand.vmem [shape: f32[1,16,32], index: 0, kind: input, shape index: {}]   ;;  %s1024_s3 = inlined_call_operand.vmem [shape: f32[1,128], index: 3, kind: input, shape index: {}]   ;;  %s1025_s4 = inlined_call_operand.vmem [shape: bf16[32,32], index: 4, kind: input, shape index: {}]   ;;  %s1026_s5 = inlined_call_operand.vmem [shape: f32[1,32], index: 5, kind: input, shape index: {}]   ;;  %s1027_s6 = inlined_call_operand.vmem [shape: bf16[32,32], index: 6, kind: input, shape index: {}]   ;;  %s1028_s7 = inlined_call_operand.vmem [shape: f32[1,32], index: 7, kind: input, shape index: {}]   ;;  %s1029_s8 = inlined_call_operand.vmem [shape: f32[1,16,32], index: 8, kind: output, shape index: {}]  }
   0x1   :  { %v754_v0 = vld [vmem:[%s1021_s1 + $0x8] sm:$0xff]  ;;  %35 = vst.msk [vmem:[#allocation2] sm:$0x3] %vm34_vm0, %v832_v2  ;;  %v753_v3 = vld [vmem:[%s1021_s1] sm:$0xff] }
   0x2   :  { %v756_v1 = vld [vmem:[%s1022_s2 + $0x8] sm:$0xff]  ;;  %v755_v4 = vld [vmem:[%s1022_s2] sm:$0xff]  ;;  %36 = vst.msk [vmem:[#allocation3] sm:$0x3] %vm34_vm0, %v832_v2  ;;  %70 = vmatpush.bf16.msra.mxu0 %v754_v0  ;;  %s833_s2 = smov 64  }
   0x3   :  { %109 = vmatpush.bf16.msra.mxu1 %v756_v1  ;;  %v37_v5 = vld [vmem:[%s1023_s0] sm:$0xff]  ;;  %v38_v6 = vld [vmem:[%s1023_s0 + $0x8] sm:$0xff]  ;;  %178 = vmatpush.bf16.msra.mxu2 %v756_v1 }
   0x4   :  { %242 = vmatpush.bf16.msra.mxu3 %v756_v1  ;;  %v39_v7 = vpack.c.bf16 %v38_v6, %v37_v5  ;;  %v765_v10 = vld [vmem:[%s1024_s3] ss:$0 sm:$0xff]  ;;  %s835_s3 = smov 96  }
   0x6   :  { %71 = vmatpush.bf16.msra.mxu0 %v753_v3 }
   0x7   :  { %110 = vmatpush.bf16.msra.mxu1 %v755_v4  ;;  %179 = vmatpush.bf16.msra.mxu2 %v755_v4 }
   0x8   :  { %v84_v8 = vld [vmem:[#allocation2] sm:$0x3]  ;;  %243 = vmatpush.bf16.msra.mxu3 %v755_v4 }
   0x9   :  { %v87_v9 = vpack.c.bf16 %v84_v8, %v84_v8  ;;  %710 = vmatmul.msk.bf16.vlgmr.msra.gmra.mxu0 %vm60_vm1, %v39_v7  ;;  %v85_v20 = vld [vmem:[#allocation3] sm:$0x3] }
   0xa   :  { %306 = vmatpush.bf16.msrb.mxu0 %v756_v1 }
   0xb   :  { %370 = vmatpush.bf16.msrb.mxu1 %v756_v1  ;;  %434 = vmatpush.bf16.msrb.mxu2 %v756_v1 }
   0xc   :  { %719 = vmatmul.msk.bf16.vlgmr.msra.gmra.mxu1 %vm60_vm1, %v87_v9  ;;  %498 = vmatpush.bf16.msrb.mxu3 %v756_v1 }
   0xe   :  { %307 = vmatpush.bf16.msrb.mxu0 %v755_v4 }
   0xf   :  { %371 = vmatpush.bf16.msrb.mxu1 %v755_v4  ;;  %435 = vmatpush.bf16.msrb.mxu2 %v755_v4 }
  0x10   :  { %499 = vmatpush.bf16.msrb.mxu3 %v755_v4 }
  0x12   :  { %562 = vmatpush.bf16.msra.mxu0 %v756_v1 }
  0x16   :  { %563 = vmatpush.bf16.msra.mxu0 %v755_v4 }
  0x86   :  { %v73_v11 = vpop.f32.mrf.mxu0 }
  0x87   :  { %v74_v12 = vadd.f32 %v765_v10, %v73_v11 }
  0x89   :  { %v112_v13 = vpop.f32.mrf.mxu1  ;;  %78 = vst [vmem:[#allocation4] sm:$0xff] %v74_v12 }
  0x8e   :  { %v75_v14 = vpop.f32.mrf.mxu0 }
  0x8f   :  { %v76_v15 = vadd.f32 %v765_v10, %v75_v14 }
  0x90   :  { %v86_v17 = vld [vmem:[#allocation4] sm:$0x3]  ;;  %v164_v45 = vld [vmem:[#allocation4 + $0x2] sm:$0x3]  ;;  %v228_v9 = vld [vmem:[#allocation4 + $0x4] sm:$0x3] }
  0x91   :  { %v114_v16 = vpop.f32.mrf.mxu1  ;;  %v116_v18 = vadd.f32 %v112_v13, %v86_v17  ;;  %79 = vst [vmem:[#allocation4 + $0x8] sm:$0xff] %v76_v15 }
  0x93   :  { %768 = vtanh.f32 %v116_v18  ;;  %v720_v21 = vmul.f32 -1.442695, %v116_v18 }
  0x95   :  { %770 = vpow2.f32 %v720_v21 }
  0x99   :  { %v769_v19 = vpop.eup %768 }
  0x9a   :  { %143 = vrot.lane.b32.xlu0 %v769_v19, %s833_s2 }
  0x9b   :  { %v771_v22 = vpop.eup %770 }
  0x9c   :  { %v120_v23 = vadd.f32 1.0, %v771_v22 }
  0x9e   :  { %772 = vrcp.f32 %v120_v23  ;;  %v132_v29 = vand.u32 2147483648, %v120_v23  ;;  %vm126_vm3 = vweird.f32 %v120_v23  ;;  %v130_v30 = vand.u32 2147483647, %v120_v23 }
  0xa0   :  { %v133_v32 = vor.u32 1.1754944e-38, %v132_v29  ;;  %vm131_vm5 = vcmp.eq.f32.partialorder %v130_v30, 8.507059e+37 }
  0xa2   :  { %138 = vrot.lane.b32.xlu0 %v85_v20, %s834_s17 }
  0xa4   :  { %v773_v24 = vpop.eup %772 }
  0xa5   :  { %v122_v25 = vmul.f32 %v773_v24, %v120_v23  ;;  %vm127_vm2 = vweird.f32 %v773_v24 }
  0xa6   :  { %vm128_vm4 = vmor %vm126_vm3, %vm127_vm2 }
  0xa7   :  { %v123_v26 = vsub.f32 1.0, %v122_v25 }
  0xa9   :  { %v124_v27 = vmul.f32 %v773_v24, %v123_v26 }
  0xab   :  { %v125_v28 = vadd.f32 %v773_v24, %v124_v27 }
  0xad   :  { %v129_v31 = vsel %vm128_vm4, %v773_v24, %v125_v28 }
  0xae   :  { %v134_v34 = vsel %vm131_vm5, %v133_v32, %v129_v31 }
 0x10c   :  { %v144_v33 = vpop.permute.xlu0 %143 }
 0x10d   :  { %v146_v35 = vmul.f32 %v144_v33, %v134_v34 }
 0x10f   :  { %148 = vrot.lane.b32.xlu1 %v146_v35, %s834_s17 }
 0x114   :  { %v139_v36 = vpop.permute.xlu0 %138 }
 0x115   :  { %v141_v37 = vmul.f32 %v139_v36, %v134_v34 }
 0x181   :  { %v149_v38 = vpop.permute.xlu1 %148 }
 0x182   :  { %v151_v39 = vadd.f32 %v149_v38, %v141_v37  ;;  %v292_v37 = vld [vmem:[#allocation4 + $0x6] sm:$0x3] }
 0x184   :  { %774 = vtanh.f32 %v151_v39 }
 0x18a   :  { %v775_v40 = vpop.eup %774 }
 0x18b   :  { %154 = vrot.lane.b32.xlu1 %v775_v40, %s833_s2 }
 0x1fd   :  { %v155_v41 = vpop.permute.xlu1 %154 }
 0x1fe   :  { %v910_v42 = vmul.f32 %v155_v41, %v134_v34 }
 0x200   :  { %v165_v43 = vpack.c.bf16 %v910_v42, %v910_v42 }
 0x202   :  { %167 = vrot.lane.b32.xlu2 %v165_v43, %s834_s17 }
 0x25c   :  { %v168_v44 = vpop.permute.xlu2 %167 }
 0x25d   :  { %721 = vmatmul.msk.bf16.vlgmr.msra.gmra.mxu2 %vm60_vm1, %v168_v44 }
 0x2e0   :  { %v181_v46 = vpop.f32.mrf.mxu2 }
 0x2e1   :  { %v185_v47 = vadd.f32 %v181_v46, %v164_v45 }
 0x2e3   :  { %776 = vtanh.f32 %v185_v47  ;;  %v722_v50 = vmul.f32 -1.442695, %v185_v47 }
 0x2e5   :  { %778 = vpow2.f32 %v722_v50 }
 0x2e8   :  { %v183_v48 = vpop.f32.mrf.mxu2 }
 0x2e9   :  { %v777_v49 = vpop.eup %776 }
 0x2ea   :  { %208 = vrot.lane.b32.xlu2 %v777_v49, %s833_s2 }
 0x2eb   :  { %v779_v51 = vpop.eup %778 }
 0x2ec   :  { %v189_v52 = vadd.f32 1.0, %v779_v51 }
 0x2ee   :  { %780 = vrcp.f32 %v189_v52  ;;  %v201_v58 = vand.u32 2147483648, %v189_v52  ;;  %vm195_vm7 = vweird.f32 %v189_v52  ;;  %v199_v59 = vand.u32 2147483647, %v189_v52 }
 0x2f0   :  { %v202_v61 = vor.u32 1.1754944e-38, %v201_v58  ;;  %vm200_vm9 = vcmp.eq.f32.partialorder %v199_v59, 8.507059e+37 }
 0x2f4   :  { %v781_v53 = vpop.eup %780 }
 0x2f5   :  { %v191_v54 = vmul.f32 %v781_v53, %v189_v52  ;;  %vm196_vm6 = vweird.f32 %v781_v53 }
 0x2f6   :  { %vm197_vm8 = vmor %vm195_vm7, %vm196_vm6 }
 0x2f7   :  { %v192_v55 = vsub.f32 1.0, %v191_v54 }
 0x2f9   :  { %v193_v56 = vmul.f32 %v781_v53, %v192_v55 }
 0x2fb   :  { %v194_v57 = vadd.f32 %v781_v53, %v193_v56 }
 0x2fd   :  { %v198_v60 = vsel %vm197_vm8, %v781_v53, %v194_v57 }
 0x2fe   :  { %v203_v63 = vsel %vm200_vm9, %v202_v61, %v198_v60 }
 0x2ff   :  { %v206_v1 = vmul.f32 %v203_v63, %v151_v39 }
 0x344   :  { %v209_v62 = vpop.permute.xlu2 %208 }
 0x345   :  { %v211_v0 = vmul.f32 %v209_v62, %v203_v63 }
 0x347   :  { %213 = vrot.lane.b32.xlu0 %v211_v0, %s834_s17 }
 0x3b9   :  { %v214_v2 = vpop.permute.xlu0 %213 }
 0x3ba   :  { %v216_v3 = vadd.f32 %v214_v2, %v206_v1  ;;  %v356_v2 = vld [vmem:[#allocation4 + $0x8] sm:$0x3] }
 0x3bc   :  { %782 = vtanh.f32 %v216_v3 }
 0x3c2   :  { %v783_v4 = vpop.eup %782 }
 0x3c3   :  { %219 = vrot.lane.b32.xlu1 %v783_v4, %s833_s2 }
 0x435   :  { %v220_v5 = vpop.permute.xlu1 %219 }
 0x436   :  { %v919_v6 = vmul.f32 %v220_v5, %v203_v63 }
 0x438   :  { %v229_v7 = vpack.c.bf16 %v919_v6, %v919_v6 }
 0x43a   :  { %231 = vrot.lane.b32.xlu2 %v229_v7, %s834_s17 }
 0x494   :  { %v232_v8 = vpop.permute.xlu2 %231 }
 0x495   :  { %723 = vmatmul.msk.bf16.vlgmr.msra.gmra.mxu3 %vm60_vm1, %v232_v8 }
 0x518   :  { %v245_v10 = vpop.f32.mrf.mxu3 }
 0x519   :  { %v249_v11 = vadd.f32 %v245_v10, %v228_v9 }
 0x51b   :  { %784 = vtanh.f32 %v249_v11  ;;  %v724_v14 = vmul.f32 -1.442695, %v249_v11 }
 0x51d   :  { %786 = vpow2.f32 %v724_v14 }
 0x520   :  { %v247_v12 = vpop.f32.mrf.mxu3 }
 0x521   :  { %v785_v13 = vpop.eup %784 }
 0x522   :  { %272 = vrot.lane.b32.xlu0 %v785_v13, %s833_s2 }
 0x523   :  { %v787_v15 = vpop.eup %786 }
 0x524   :  { %v253_v16 = vadd.f32 1.0, %v787_v15 }
 0x526   :  { %788 = vrcp.f32 %v253_v16  ;;  %v265_v22 = vand.u32 2147483648, %v253_v16  ;;  %vm259_vm11 = vweird.f32 %v253_v16  ;;  %v263_v23 = vand.u32 2147483647, %v253_v16 }
 0x528   :  { %v266_v25 = vor.u32 1.1754944e-38, %v265_v22  ;;  %vm264_vm13 = vcmp.eq.f32.partialorder %v263_v23, 8.507059e+37 }
 0x52c   :  { %v789_v17 = vpop.eup %788 }
 0x52d   :  { %v255_v18 = vmul.f32 %v789_v17, %v253_v16  ;;  %vm260_vm10 = vweird.f32 %v789_v17 }
 0x52e   :  { %vm261_vm12 = vmor %vm259_vm11, %vm260_vm10 }
 0x52f   :  { %v256_v19 = vsub.f32 1.0, %v255_v18 }
 0x531   :  { %v257_v20 = vmul.f32 %v789_v17, %v256_v19 }
 0x533   :  { %v258_v21 = vadd.f32 %v789_v17, %v257_v20 }
 0x535   :  { %v262_v24 = vsel %vm261_vm12, %v789_v17, %v258_v21 }
 0x536   :  { %v267_v27 = vsel %vm264_vm13, %v266_v25, %v262_v24 }
 0x537   :  { %v270_v29 = vmul.f32 %v267_v27, %v216_v3 }
 0x594   :  { %v273_v26 = vpop.permute.xlu0 %272 }
 0x595   :  { %v275_v28 = vmul.f32 %v273_v26, %v267_v27 }
 0x597   :  { %277 = vrot.lane.b32.xlu1 %v275_v28, %s834_s17 }
 0x609   :  { %v278_v30 = vpop.permute.xlu1 %277 }
 0x60a   :  { %v280_v31 = vadd.f32 %v278_v30, %v270_v29 }
 0x60c   :  { %790 = vtanh.f32 %v280_v31 }
 0x612   :  { %v791_v32 = vpop.eup %790 }
 0x613   :  { %283 = vrot.lane.b32.xlu2 %v791_v32, %s833_s2 }
 0x66d   :  { %v284_v33 = vpop.permute.xlu2 %283 }
 0x66e   :  { %v928_v34 = vmul.f32 %v284_v33, %v267_v27 }
 0x670   :  { %v293_v35 = vpack.c.bf16 %v928_v34, %v928_v34 }
 0x672   :  { %295 = vrot.lane.b32.xlu0 %v293_v35, %s834_s17 }
 0x6e4   :  { %v296_v36 = vpop.permute.xlu0 %295 }
 0x6e5   :  { %725 = vmatmul.msk.bf16.vlgmr.msrb.gmra.mxu0 %vm60_vm1, %v296_v36 }
 0x762   :  { %v309_v38 = vpop.f32.mrf.mxu0 }
 0x763   :  { %v313_v39 = vadd.f32 %v309_v38, %v292_v37 }
 0x765   :  { %792 = vtanh.f32 %v313_v39  ;;  %v726_v43 = vmul.f32 -1.442695, %v313_v39 }
 0x767   :  { %794 = vpow2.f32 %v726_v43 }
 0x76a   :  { %v311_v40 = vpop.f32.mrf.mxu0 }
 0x76b   :  { %v793_v41 = vpop.eup %792 }
 0x76c   :  { %336 = vrot.lane.b32.xlu1 %v793_v41, %s833_s2 }
 0x76d   :  { %v795_v44 = vpop.eup %794 }
 0x76e   :  { %v317_v45 = vadd.f32 1.0, %v795_v44 }
 0x770   :  { %796 = vrcp.f32 %v317_v45  ;;  %v329_v51 = vand.u32 2147483648, %v317_v45  ;;  %vm323_vm15 = vweird.f32 %v317_v45  ;;  %v327_v52 = vand.u32 2147483647, %v317_v45 }
 0x772   :  { %v330_v54 = vor.u32 1.1754944e-38, %v329_v51  ;;  %vm328_vm3 = vcmp.eq.f32.partialorder %v327_v52, 8.507059e+37 }
 0x776   :  { %v797_v46 = vpop.eup %796 }
 0x777   :  { %v319_v47 = vmul.f32 %v797_v46, %v317_v45  ;;  %vm324_vm14 = vweird.f32 %v797_v46 }
 0x778   :  { %vm325_vm2 = vmor %vm323_vm15, %vm324_vm14 }
 0x779   :  { %v320_v48 = vsub.f32 1.0, %v319_v47 }
 0x77b   :  { %v321_v49 = vmul.f32 %v797_v46, %v320_v48 }
 0x77d   :  { %v322_v50 = vadd.f32 %v797_v46, %v321_v49 }
 0x77f   :  { %v326_v53 = vsel %vm325_vm2, %v797_v46, %v322_v50 }
 0x780   :  { %v331_v56 = vsel %vm328_vm3, %v330_v54, %v326_v53 }
 0x781   :  { %v334_v58 = vmul.f32 %v331_v56, %v280_v31  ;;  %v420_v31 = vld [vmem:[#allocation4 + $0xa] sm:$0x3] }
 0x7de   :  { %v337_v55 = vpop.permute.xlu1 %336 }
 0x7df   :  { %v339_v57 = vmul.f32 %v337_v55, %v331_v56 }
 0x7e1   :  { %341 = vrot.lane.b32.xlu2 %v339_v57, %s834_s17 }
 0x83b   :  { %v342_v59 = vpop.permute.xlu2 %341 }
 0x83c   :  { %v344_v60 = vadd.f32 %v342_v59, %v334_v58 }
 0x83e   :  { %798 = vtanh.f32 %v344_v60 }
 0x844   :  { %v799_v61 = vpop.eup %798 }
 0x845   :  { %347 = vrot.lane.b32.xlu0 %v799_v61, %s833_s2  ;;  %v484_v61 = vld [vmem:[#allocation4 + $0xc] sm:$0x3] }
 0x8b7   :  { %v348_v62 = vpop.permute.xlu0 %347 }
 0x8b8   :  { %v937_v63 = vmul.f32 %v348_v62, %v331_v56 }
 0x8ba   :  { %v357_v0 = vpack.c.bf16 %v937_v63, %v937_v63 }
 0x8bc   :  { %359 = vrot.lane.b32.xlu1 %v357_v0, %s834_s17 }
 0x92e   :  { %v360_v1 = vpop.permute.xlu1 %359 }
 0x92f   :  { %727 = vmatmul.msk.bf16.vlgmr.msrb.gmra.mxu1 %vm60_vm1, %v360_v1 }
 0x9ac   :  { %v373_v3 = vpop.f32.mrf.mxu1 }
 0x9ad   :  { %v377_v4 = vadd.f32 %v373_v3, %v356_v2 }
 0x9af   :  { %800 = vtanh.f32 %v377_v4  ;;  %v728_v8 = vmul.f32 -1.442695, %v377_v4 }
 0x9b1   :  { %802 = vpow2.f32 %v728_v8 }
 0x9b4   :  { %v375_v5 = vpop.f32.mrf.mxu1 }
 0x9b5   :  { %v801_v7 = vpop.eup %800 }
 0x9b6   :  { %400 = vrot.lane.b32.xlu2 %v801_v7, %s833_s2 }
 0x9b7   :  { %v803_v9 = vpop.eup %802 }
 0x9b8   :  { %v381_v10 = vadd.f32 1.0, %v803_v9 }
 0x9ba   :  { %804 = vrcp.f32 %v381_v10  ;;  %v393_v16 = vand.u32 2147483648, %v381_v10  ;;  %vm387_vm5 = vweird.f32 %v381_v10  ;;  %v391_v17 = vand.u32 2147483647, %v381_v10 }
 0x9bc   :  { %v394_v19 = vor.u32 1.1754944e-38, %v393_v16  ;;  %vm392_vm7 = vcmp.eq.f32.partialorder %v391_v17, 8.507059e+37 }
 0x9c0   :  { %v805_v11 = vpop.eup %804 }
 0x9c1   :  { %v383_v12 = vmul.f32 %v805_v11, %v381_v10  ;;  %vm388_vm4 = vweird.f32 %v805_v11 }
 0x9c2   :  { %vm389_vm6 = vmor %vm387_vm5, %vm388_vm4 }
 0x9c3   :  { %v384_v13 = vsub.f32 1.0, %v383_v12 }
 0x9c5   :  { %v385_v14 = vmul.f32 %v805_v11, %v384_v13 }
 0x9c7   :  { %v386_v15 = vadd.f32 %v805_v11, %v385_v14 }
 0x9c9   :  { %v390_v18 = vsel %vm389_vm6, %v805_v11, %v386_v15 }
 0x9ca   :  { %v395_v21 = vsel %vm392_vm7, %v394_v19, %v390_v18 }
 0x9cb   :  { %v398_v23 = vmul.f32 %v395_v21, %v344_v60 }
 0xa10   :  { %v401_v20 = vpop.permute.xlu2 %400 }
 0xa11   :  { %v403_v22 = vmul.f32 %v401_v20, %v395_v21 }
 0xa13   :  { %405 = vrot.lane.b32.xlu0 %v403_v22, %s834_s17 }
 0xa85   :  { %v406_v24 = vpop.permute.xlu0 %405 }
 0xa86   :  { %v408_v25 = vadd.f32 %v406_v24, %v398_v23 }
 0xa88   :  { %806 = vtanh.f32 %v408_v25 }
 0xa8e   :  { %v807_v26 = vpop.eup %806 }
 0xa8f   :  { %411 = vrot.lane.b32.xlu1 %v807_v26, %s833_s2 }
 0xb01   :  { %v412_v27 = vpop.permute.xlu1 %411 }
 0xb02   :  { %v946_v28 = vmul.f32 %v412_v27, %v395_v21  ;;  %v548_v27 = vld [vmem:[#allocation4 + $0xe] sm:$0x3] }
 0xb04   :  { %v421_v29 = vpack.c.bf16 %v946_v28, %v946_v28 }
 0xb06   :  { %423 = vrot.lane.b32.xlu2 %v421_v29, %s834_s17 }
 0xb60   :  { %v424_v30 = vpop.permute.xlu2 %423 }
 0xb61   :  { %729 = vmatmul.msk.bf16.vlgmr.msrb.gmra.mxu2 %vm60_vm1, %v424_v30 }
 0xbe4   :  { %v437_v32 = vpop.f32.mrf.mxu2 }
 0xbe5   :  { %v441_v33 = vadd.f32 %v437_v32, %v420_v31 }
 0xbe7   :  { %808 = vtanh.f32 %v441_v33  ;;  %v730_v37 = vmul.f32 -1.442695, %v441_v33 }
 0xbe9   :  { %810 = vpow2.f32 %v730_v37 }
 0xbec   :  { %v439_v35 = vpop.f32.mrf.mxu2 }
 0xbed   :  { %v809_v36 = vpop.eup %808 }
 0xbee   :  { %464 = vrot.lane.b32.xlu0 %v809_v36, %s833_s2 }
 0xbef   :  { %v811_v38 = vpop.eup %810 }
 0xbf0   :  { %v445_v39 = vadd.f32 1.0, %v811_v38 }
 0xbf2   :  { %812 = vrcp.f32 %v445_v39  ;;  %v457_v46 = vand.u32 2147483648, %v445_v39  ;;  %vm451_vm9 = vweird.f32 %v445_v39  ;;  %v455_v47 = vand.u32 2147483647, %v445_v39 }
 0xbf4   :  { %v458_v49 = vor.u32 1.1754944e-38, %v457_v46  ;;  %vm456_vm11 = vcmp.eq.f32.partialorder %v455_v47, 8.507059e+37 }
 0xbf8   :  { %v813_v40 = vpop.eup %812 }
 0xbf9   :  { %v447_v41 = vmul.f32 %v813_v40, %v445_v39  ;;  %vm452_vm8 = vweird.f32 %v813_v40 }
 0xbfa   :  { %vm453_vm10 = vmor %vm451_vm9, %vm452_vm8 }
 0xbfb   :  { %v448_v43 = vsub.f32 1.0, %v447_v41 }
 0xbfd   :  { %v449_v44 = vmul.f32 %v813_v40, %v448_v43 }
 0xbff   :  { %v450_v45 = vadd.f32 %v813_v40, %v449_v44 }
 0xc01   :  { %v454_v48 = vsel %vm453_vm10, %v813_v40, %v450_v45 }
 0xc02   :  { %v459_v51 = vsel %vm456_vm11, %v458_v49, %v454_v48 }
 0xc03   :  { %v462_v53 = vmul.f32 %v459_v51, %v408_v25 }
 0xc60   :  { %v465_v50 = vpop.permute.xlu0 %464 }
 0xc61   :  { %v467_v52 = vmul.f32 %v465_v50, %v459_v51 }
 0xc63   :  { %469 = vrot.lane.b32.xlu1 %v467_v52, %s834_s17 }
 0xcd5   :  { %v470_v54 = vpop.permute.xlu1 %469 }
 0xcd6   :  { %v472_v55 = vadd.f32 %v470_v54, %v462_v53 }
 0xcd8   :  { %814 = vtanh.f32 %v472_v55 }
 0xcde   :  { %v815_v56 = vpop.eup %814 }
 0xcdf   :  { %475 = vrot.lane.b32.xlu2 %v815_v56, %s833_s2 }
 0xd39   :  { %v476_v57 = vpop.permute.xlu2 %475 }
 0xd3a   :  { %v955_v58 = vmul.f32 %v476_v57, %v459_v51 }
 0xd3c   :  { %v485_v59 = vpack.c.bf16 %v955_v58, %v955_v58 }
 0xd3e   :  { %487 = vrot.lane.b32.xlu0 %v485_v59, %s834_s17 }
 0xdb0   :  { %v488_v60 = vpop.permute.xlu0 %487 }
 0xdb1   :  { %731 = vmatmul.msk.bf16.vlgmr.msrb.gmra.mxu3 %vm60_vm1, %v488_v60 }
 0xe34   :  { %v501_v62 = vpop.f32.mrf.mxu3 }
 0xe35   :  { %v505_v0 = vadd.f32 %v501_v62, %v484_v61  ;;  %v760_v61 = vld [vmem:[%s1027_s6 + $0x8] sm:$0xff] }
 0xe36   :  { %688 = vmatpush.bf16.msra.mxu2 %v760_v61 }
 0xe37   :  { %816 = vtanh.f32 %v505_v0  ;;  %v732_v3 = vmul.f32 -1.442695, %v505_v0 }
 0xe39   :  { %818 = vpow2.f32 %v732_v3  ;;  %v759_v3 = vld [vmem:[%s1027_s6] sm:$0xff] }
 0xe3a   :  { %689 = vmatpush.bf16.msra.mxu2 %v759_v3 }
 0xe3c   :  { %v503_v1 = vpop.f32.mrf.mxu3 }
 0xe3d   :  { %v817_v2 = vpop.eup %816 }
 0xe3e   :  { %528 = vrot.lane.b32.xlu1 %v817_v2, %s833_s2 }
 0xe3f   :  { %v819_v4 = vpop.eup %818 }
 0xe40   :  { %v509_v5 = vadd.f32 1.0, %v819_v4 }
 0xe42   :  { %820 = vrcp.f32 %v509_v5  ;;  %v521_v12 = vand.u32 2147483648, %v509_v5  ;;  %vm515_vm13 = vweird.f32 %v509_v5  ;;  %v519_v13 = vand.u32 2147483647, %v509_v5 }
 0xe44   :  { %v522_v15 = vor.u32 1.1754944e-38, %v521_v12  ;;  %vm520_vm15 = vcmp.eq.f32.partialorder %v519_v13, 8.507059e+37 }
 0xe48   :  { %v821_v7 = vpop.eup %820 }
 0xe49   :  { %v511_v8 = vmul.f32 %v821_v7, %v509_v5  ;;  %vm516_vm12 = vweird.f32 %v821_v7  ;;  %v766_v5 = vld [vmem:[%s1026_s5] ss:$0 sm:$0xff] }
 0xe4a   :  { %vm517_vm14 = vmor %vm515_vm13, %vm516_vm12 }
 0xe4b   :  { %v512_v9 = vsub.f32 1.0, %v511_v8 }
 0xe4d   :  { %v513_v10 = vmul.f32 %v821_v7, %v512_v9 }
 0xe4f   :  { %v514_v11 = vadd.f32 %v821_v7, %v513_v10 }
 0xe51   :  { %v518_v14 = vsel %vm517_vm14, %v821_v7, %v514_v11  ;;  %v767_v11 = vld [vmem:[%s1028_s7] ss:$0 sm:$0xff] }
 0xe52   :  { %v523_v17 = vsel %vm520_vm15, %v522_v15, %v518_v14 }
 0xe53   :  { %v526_v19 = vmul.f32 %v523_v17, %v472_v55 }
 0xeb0   :  { %v529_v16 = vpop.permute.xlu1 %528 }
 0xeb1   :  { %v531_v18 = vmul.f32 %v529_v16, %v523_v17 }
 0xeb3   :  { %533 = vrot.lane.b32.xlu2 %v531_v18, %s834_s17 }
 0xf0d   :  { %v534_v20 = vpop.permute.xlu2 %533 }
 0xf0e   :  { %v536_v21 = vadd.f32 %v534_v20, %v526_v19 }
 0xf10   :  { %822 = vtanh.f32 %v536_v21 }
 0xf16   :  { %v823_v22 = vpop.eup %822 }
 0xf17   :  { %539 = vrot.lane.b32.xlu0 %v823_v22, %s833_s2 }
 0xf89   :  { %v540_v23 = vpop.permute.xlu0 %539 }
 0xf8a   :  { %v542_v24 = vmul.f32 %v540_v23, %v523_v17 }
 0xf8c   :  { %v549_v25 = vpack.c.bf16 %v542_v24, %v542_v24 }
 0xf8e   :  { %551 = vrot.lane.b32.xlu1 %v549_v25, %s834_s17 }
0x1000   :  { %v552_v26 = vpop.permute.xlu1 %551 }
0x1001   :  { %733 = vmatmul.msk.bf16.vlgmr.msra.gmra.mxu0 %vm60_vm1, %v552_v26 }
0x107e   :  { %v565_v29 = vpop.f32.mrf.mxu0 }
0x107f   :  { %v569_v30 = vadd.f32 %v565_v29, %v548_v27 }
0x1081   :  { %824 = vtanh.f32 %v569_v30  ;;  %v734_v33 = vmul.f32 -1.442695, %v569_v30 }
0x1083   :  { %826 = vpow2.f32 %v734_v33 }
0x1086   :  { %v567_v31 = vpop.f32.mrf.mxu0 }
0x1087   :  { %v825_v32 = vpop.eup %824 }
0x1088   :  { %592 = vrot.lane.b32.xlu2 %v825_v32, %s833_s2 }
0x1089   :  { %v827_v35 = vpop.eup %826 }
0x108a   :  { %v573_v36 = vadd.f32 1.0, %v827_v35 }
0x108c   :  { %828 = vrcp.f32 %v573_v36  ;;  %v585_v43 = vand.u32 2147483648, %v573_v36  ;;  %vm579_vm3 = vweird.f32 %v573_v36  ;;  %v583_v44 = vand.u32 2147483647, %v573_v36 }
0x108e   :  { %v586_v45 = vor.u32 1.1754944e-38, %v585_v43  ;;  %vm584_vm5 = vcmp.eq.f32.partialorder %v583_v44, 8.507059e+37 }
0x1090   :  { %159 = vrot.lane.b32.xlu2 %v910_v42, %s834_s17 }
0x1092   :  { %v829_v37 = vpop.eup %828 }
0x1093   :  { %v575_v38 = vmul.f32 %v829_v37, %v573_v36  ;;  %vm580_vm2 = vweird.f32 %v829_v37 }
0x1094   :  { %vm581_vm4 = vmor %vm579_vm3, %vm580_vm2 }
0x1095   :  { %v576_v39 = vsub.f32 1.0, %v575_v38 }
0x1097   :  { %v577_v40 = vmul.f32 %v829_v37, %v576_v39 }
0x1098   :  { %352 = vrot.lane.b32.xlu2 %v937_v63, %s834_s17 }
0x1099   :  { %v578_v41 = vadd.f32 %v829_v37, %v577_v40 }
0x109b   :  { %v582_v42 = vsel %vm581_vm4, %v829_v37, %v578_v41 }
0x109c   :  { %v587_v46 = vsel %vm584_vm5, %v586_v45, %v582_v42 }
0x109d   :  { %v590_v51 = vmul.f32 %v587_v46, %v536_v21 }
0x10a0   :  { %544 = vrot.lane.b32.xlu2 %v542_v24, %s834_s17 }
0x10e2   :  { %v593_v63 = vpop.permute.xlu2 %592 }
0x10e3   :  { %v595_v47 = vmul.f32 %v593_v63, %v587_v46 }
0x10e5   :  { %597 = vrot.lane.b32.xlu0 %v595_v47, %s834_s17 }
0x10ea   :  { %v160_v48 = vpop.permute.xlu2 %159 }
0x10eb   :  { %163 = vst.msk [vmem:[#allocation5] sm:$0x3] %vm34_vm0, %v160_v48 }
0x10ed   :  { %224 = vrot.lane.b32.xlu0 %v919_v6, %s834_s17 }
0x10f2   :  { %v353_v49 = vpop.permute.xlu2 %352 }
0x10f3   :  { %355 = vst.msk [vmem:[#allocation5 + $0x6] sm:$0x3] %vm34_vm0, %v353_v49 }
0x10f5   :  { %416 = vrot.lane.b32.xlu0 %v946_v28, %s834_s17  ;;  %v758_v28 = vld [vmem:[%s1025_s4 + $0x8] sm:$0xff] }
0x10f6   :  { %650 = vmatpush.bf16.msra.mxu1 %v758_v28 }
0x10fa   :  { %v545_v50 = vpop.permute.xlu2 %544 }
0x10fb   :  { %547 = vst.msk [vmem:[#allocation5 + $0xc] sm:$0x3] %vm34_vm0, %v545_v50 }
0x1157   :  { %v598_v52 = vpop.permute.xlu0 %597 }
0x1158   :  { %v600_v53 = vadd.f32 %v598_v52, %v590_v51 }
0x115a   :  { %830 = vtanh.f32 %v600_v53 }
0x115f   :  { %v225_v54 = vpop.permute.xlu0 %224 }
0x1160   :  { %v831_v55 = vpop.eup %830  ;;  %227 = vst.msk [vmem:[#allocation5 + $0x2] sm:$0x3] %vm34_vm0, %v225_v54 }
0x1161   :  { %603 = vrot.lane.b32.xlu1 %v831_v55, %s833_s2 }
0x1167   :  { %v417_v6 = vpop.permute.xlu0 %416 }
0x1168   :  { %419 = vst.msk [vmem:[#allocation5 + $0x8] sm:$0x3] %vm34_vm0, %v417_v6 }
0x1169   :  { %288 = vrot.lane.b32.xlu1 %v928_v34, %s834_s17 }
0x1171   :  { %480 = vrot.lane.b32.xlu1 %v955_v58, %s834_s17  ;;  %v757_v58 = vld [vmem:[%s1025_s4] sm:$0xff] }
0x1172   :  { %651 = vmatpush.bf16.msra.mxu1 %v757_v58 }
0x1179   :  { %614 = vrot.lane.b32.xlu1 %v600_v53, %s835_s3 }
0x11d3   :  { %v604_v56 = vpop.permute.xlu1 %603 }
0x11d4   :  { %v606_v57 = vmul.f32 %v604_v56, %v587_v46 }
0x11d6   :  { %608 = vrot.lane.b32.xlu0 %v606_v57, %s834_s17 }
0x11db   :  { %v289_v59 = vpop.permute.xlu1 %288 }
0x11dc   :  { %291 = vst.msk [vmem:[#allocation5 + $0x4] sm:$0x3] %vm34_vm0, %v289_v59 }
0x11e3   :  { %v481_v60 = vpop.permute.xlu1 %480  ;;  %v618_v0 = vld [vmem:[#allocation5] sm:$0xff] }
0x11e4   :  { %483 = vst.msk [vmem:[#allocation5 + $0xa] sm:$0x3] %vm34_vm0, %v481_v60 }
0x11eb   :  { %v615_v34 = vpop.permute.xlu1 %614 }
0x11ec   :  { %617 = vst.msk [vmem:[#allocation3] sm:$0x3] %vm34_vm0, %v615_v34 }
0x1248   :  { %v609_v62 = vpop.permute.xlu0 %608 }
0x1249   :  { %611 = vst.msk [vmem:[#allocation5 + $0xe] sm:$0x3] %vm34_vm0, %v609_v62 }
0x124a   :  { %612 = vst.msk [vmem:[#allocation2] sm:$0x3] %vm34_vm0, %v609_v62 }
0x1250   :  { %v619_v1 = vld [vmem:[#allocation5 + $0x8] sm:$0xff] }
0x1251   :  { %v620_v2 = vpack.c.bf16 %v619_v1, %v618_v0 }
0x1253   :  { %743 = vmatmul.msk.bf16.vlgmr.msra.gmra.mxu1 %vm60_vm1, %v620_v2 }
0x12d0   :  { %v653_v4 = vpop.f32.mrf.mxu1 }
0x12d1   :  { %v654_v8 = vadd.f32 %v766_v5, %v653_v4 }
0x12d8   :  { %v655_v7 = vpop.f32.mrf.mxu1 }
0x12d9   :  { %v656_v9 = vadd.f32 %v766_v5, %v655_v7 }
0x12db   :  { %v658_v10 = vpack.c.bf16 %v656_v9, %v654_v8 }
0x12dd   :  { %752 = vmatmul.msk.bf16.vlgmr.msra.gmra.mxu2 %vm60_vm1, %v658_v10 }
0x1360   :  { %v691_v12 = vpop.f32.mrf.mxu2 }
0x1361   :  { %v692_v13 = vadd.f32 %v767_v11, %v691_v12 }
0x1363   :  { %696 = vst.msk [vmem:[%s1029_s8] sm:$0xff] %vm60_vm1, %v692_v13 }
0x1368   :  { %v693_v14 = vpop.f32.mrf.mxu2 }
0x1369   :  { %v694_v15 = vadd.f32 %v767_v11, %v693_v14 }
0x136b   :  { %697 = vst.msk [vmem:[%s1029_s8 + $0x8] sm:$0xff] %vm60_vm1, %v694_v15 }

</bundles_post_ra>
